<compile_context>
chip_gen: v7x
topology: tpu7x:2x2x1
jax: 0.10.0
libtpu: 0.0.40
codegen_flags: <defaults>
</compile_context>

<pallas_src>
import functools

import jax
import jax.numpy as jnp
from jax.experimental import pallas as pl
from jax.experimental.pallas import tpu as pltpu

EPS = 1e-5  # nn.LayerNorm default
F32 = jnp.float32
BF16 = jnp.bfloat16


def _layer_norm(x, g, b):
    mu = jnp.mean(x, axis=-1, keepdims=True)
    var = jnp.mean((x - mu) ** 2, axis=-1, keepdims=True)
    return (x - mu) * jax.lax.rsqrt(var + EPS) * g + b


def cross_attention_kernel(q_ref, r_ref,
                           wqkv_ref, bqkv_ref,
                           wo_ref, bo_ref,
                           lng_ref, lnb_ref,
                           w1_ref, b1_ref, w2_ref, b2_ref,
                           mask_ref,
                           out1_ref, out2_ref,
                           *, block_b, seq, embed):
    """One grid step: `block_b` batch elements, both branches, full forward."""
    S, E = seq, embed
    two_s = 2 * S

    q = q_ref[...]          # (block_b*S, E) f32 question rows
    r = r_ref[...]          # (block_b*S, E) f32 query rows

    # Stack both sources on the sublane axis, per-batch interleaved:
    #   rows [b*2S, b*2S+S)      = question_b
    #   rows [b*2S+S, (b+1)*2S)  = query_b
    parts = []
    for b in range(block_b):
        parts.append(q[b * S:(b + 1) * S])
        parts.append(r[b * S:(b + 1) * S])
    x = jnp.concatenate(parts, axis=0)                       # (block_b*2S, E) f32

    # Fused Q|K|V projection: one bf16 MXU matmul, f32 accumulation + f32 bias.
    p = jnp.dot(x.astype(BF16), wqkv_ref[...],
                preferred_element_type=F32) + bqkv_ref[...]  # (rows, 3E) f32
    qp = p[:, :E]
    kp = p[:, E:2 * E]
    vp = p[:, 2 * E:]

    mask = mask_ref[...]    # (E, E) f32, 1.0 inside the per-head diagonal blocks

    # Reassociated bilinear attention (no softmax, no scaling):
    #   A = Q_merged @ block_diag_h(K1_h^T V1_h + K2_h^T V2_h)
    # Both branches use the same context matrix, so one (2S, E) @ (E, E) matmul
    # per batch element yields the merged-head output for question AND query.
    attn_parts = []
    for b in range(block_b):                                 # static unroll (small)
        lo, hi = b * two_s, (b + 1) * two_s
        kcat = kp[lo:hi]                                     # (2S, E): [K1_b; K2_b]
        vcat = vp[lo:hi]                                     # (2S, E): [V1_b; V2_b]
        ctx = jnp.dot(kcat.T.astype(BF16), vcat.astype(BF16),
                      preferred_element_type=F32)            # (E, E) f32
        ctx = (ctx * mask).astype(BF16)                      # keep per-head blocks only
        qcat = qp[lo:hi].astype(BF16)                        # (2S, E): [Q1_b; Q2_b]
        attn_parts.append(jnp.dot(qcat, ctx, preferred_element_type=F32))
    attn = jnp.concatenate(attn_parts, axis=0)               # (block_b*2S, E) f32

    # Shared post-block (linear_out -> add & LN -> FFN -> add & LN) for both
    # branches at once.  LayerNorm math stays f32.
    g = lng_ref[...]
    beta = lnb_ref[...]
    y = jnp.dot(attn.astype(BF16), wo_ref[...],
                preferred_element_type=F32) + bo_ref[...]
    h = _layer_norm(x + y, g, beta)
    ff = jnp.maximum(jnp.dot(h.astype(BF16), w1_ref[...],
                             preferred_element_type=F32) + b1_ref[...], 0.0)
    ff = jnp.dot(ff.astype(BF16), w2_ref[...],
                 preferred_element_type=F32) + b2_ref[...]
    h = _layer_norm(h + ff, g, beta)

    # Split rows back out (cheap sublane slices): question branch -> out1,
    # query branch -> out2.  The final feature concat happens at the XLA level.
    for b in range(block_b):
        out1_ref[b * S:(b + 1) * S, :] = h[b * two_s:b * two_s + S].astype(out1_ref.dtype)
        out2_ref[b * S:(b + 1) * S, :] = h[b * two_s + S:(b + 1) * two_s].astype(out2_ref.dtype)


def _choose_block_b(batch, seq, target_rows=256):
    """Largest divisor of `batch` whose stacked row count stays <= target."""
    best = 1
    for d in range(1, batch + 1):
        if batch % d == 0 and d * 2 * seq <= max(target_rows, 2 * seq):
            best = d
    return best


def _fuse_params(params):
    """Host-side weight prep: fused bf16 QKV weight, bf16 matmul weights, f32 biases/LN."""
    return dict(
        wqkv=jnp.concatenate([params["wq"], params["wk"], params["wv"]], axis=1).astype(BF16),
        bqkv=jnp.concatenate([params["bq"], params["bk"], params["bv"]], axis=1).astype(F32),
        wo=params["wo"].astype(BF16), bo=params["bo"].astype(F32),
        lng=params["lng"].astype(F32), lnb=params["lnb"].astype(F32),
        w1=params["w1"].astype(BF16), b1=params["b1"].astype(F32),
        w2=params["w2"].astype(BF16), b2=params["b2"].astype(F32),
    )


def _head_mask(embed, attn_dim):
    head_id = jnp.arange(embed, dtype=jnp.int32) // attn_dim
    return (head_id[:, None] == head_id[None, :]).astype(F32)


def cross_attention(question, query, params, heads, block_b=None):
    B, S, E = question.shape
    assert query.shape == (B, S, E)
    assert E % heads == 0
    attn_dim = E // heads

    fused = _fuse_params(params)
    mask = _head_mask(E, attn_dim)

    if block_b is None:
        block_b = _choose_block_b(B, S)
    assert B % block_b == 0
    rows = block_b * S

    # Flatten batch into rows host-side (free XLA reshape) so the kernel only
    # ever sees 2-D lane/sublane-dense tiles.
    qf = question.reshape(B * S, E)
    rf = query.reshape(B * S, E)

    weights = [fused["wqkv"], fused["bqkv"], fused["wo"], fused["bo"],
               fused["lng"], fused["lnb"], fused["w1"], fused["b1"],
               fused["w2"], fused["b2"], mask]
    weight_specs = [pl.BlockSpec(w.shape, lambda b: (0, 0)) for w in weights]
    act_spec = pl.BlockSpec((rows, E), lambda b: (b, 0))
    out_spec = pl.BlockSpec((rows, E), lambda b: (b, 0))

    kernel = functools.partial(cross_attention_kernel,
                               block_b=block_b, seq=S, embed=E)

    out1, out2 = pl.pallas_call(
        kernel,
        out_shape=(jax.ShapeDtypeStruct((B * S, E), F32),
                   jax.ShapeDtypeStruct((B * S, E), F32)),
        grid_spec=pltpu.PrefetchScalarGridSpec(
            num_scalar_prefetch=0,
            grid=(B // block_b,),
            in_specs=[act_spec, act_spec] + weight_specs,
            out_specs=(out_spec, out_spec),
        ),
        compiler_params=pltpu.CompilerParams(
            dimension_semantics=("parallel",),
            # Explicit scoped-VMEM budget: safe on v5e/v6e (128 MiB) and v7x
            # (64 MiB); bf16 weights keep the resident footprint small.
            vmem_limit_bytes=48 * 1024 * 1024,
        ),
    )(qf, rf, *weights)

    out1 = out1.reshape(B, S, E)
    out2 = out2.reshape(B, S, E)
    return jnp.concatenate([out1, out2], axis=-1)


def cross_attention_reference(question, query, params, heads):
    """Exact f32 reference mirroring the PyTorch module (eval mode)."""
    B, S, E = question.shape
    D = E // heads

    def proj(x, w, b):
        return x @ w + b

    def split_heads(x):  # (B,S,E) -> (B,H,S,D)
        return x.reshape(B, S, heads, D).transpose(0, 2, 1, 3)

    Q1 = split_heads(proj(question, params["wq"], params["bq"]))
    K1 = split_heads(proj(question, params["wk"], params["bk"]))
    V1 = split_heads(proj(question, params["wv"], params["bv"]))
    Q2 = split_heads(proj(query, params["wq"], params["bq"]))
    K2 = split_heads(proj(query, params["wk"], params["bk"]))
    V2 = split_heads(proj(query, params["wv"], params["bv"]))

    def attn(src, Q, Ka, Kb, Va, Vb):
        a = (jnp.einsum("bhqk,bhkd->bhqd", jnp.einsum("bhqd,bhkd->bhqk", Q, Ka), Va)
             + jnp.einsum("bhqk,bhkd->bhqd", jnp.einsum("bhqd,bhkd->bhqk", Q, Kb), Vb))
        a = a.transpose(0, 2, 1, 3).reshape(B, S, E)
        x = a @ params["wo"] + params["bo"]
        x = _layer_norm(src + x, params["lng"], params["lnb"])
        ff = jnp.maximum(x @ params["w1"] + params["b1"], 0.0) @ params["w2"] + params["b2"]
        return _layer_norm(x + ff, params["lng"], params["lnb"])

    x1 = attn(question, Q1, K1, K2, V1, V2)
    x2 = attn(query, Q2, K2, K1, V2, V1)
    return jnp.concatenate([x1, x2], axis=-1)


def cross_attention_matched_reference(question, query, params, heads):
    """Pure-JAX reference with the kernel's exact math (same reassociation and
    bf16 rounding points) -- used for the tight correctness check."""
    B, S, E = question.shape
    D = E // heads
    w = _fuse_params(params)
    mask = _head_mask(E, D)

    x = jnp.concatenate([question, query], axis=1)                       # (B, 2S, E)
    p = jnp.einsum("bse,ef->bsf", x.astype(BF16), w["wqkv"],
                   preferred_element_type=F32) + w["bqkv"]
    qp, kp, vp = p[..., :E], p[..., E:2 * E], p[..., 2 * E:]
    ctx = jnp.einsum("bse,bsf->bef", kp.astype(BF16), vp.astype(BF16),
                     preferred_element_type=F32) * mask
    a = jnp.einsum("bse,bef->bsf", qp.astype(BF16), ctx.astype(BF16),
                   preferred_element_type=F32)
    y = jnp.einsum("bse,ef->bsf", a.astype(BF16), w["wo"],
                   preferred_element_type=F32) + w["bo"]
    h = _layer_norm(x + y, w["lng"], w["lnb"])
    ff = jnp.maximum(jnp.einsum("bse,ef->bsf", h.astype(BF16), w["w1"],
                                preferred_element_type=F32) + w["b1"], 0.0)
    ff = jnp.einsum("bse,ef->bsf", ff.astype(BF16), w["w2"],
                    preferred_element_type=F32) + w["b2"]
    h = _layer_norm(h + ff, w["lng"], w["lnb"])
    return jnp.concatenate([h[:, :S, :], h[:, S:, :]], axis=-1)


def init_params(key, embed_dim, pf_dim):
    ks = jax.random.split(key, 8)
    s = 0.1
    return {
        "wq": s * jax.random.normal(ks[0], (embed_dim, embed_dim), F32),
        "bq": s * jax.random.normal(ks[1], (1, embed_dim), F32),
        "wk": s * jax.random.normal(ks[2], (embed_dim, embed_dim), F32),
        "bk": s * jax.random.normal(ks[3], (1, embed_dim), F32),
        "wv": s * jax.random.normal(ks[4], (embed_dim, embed_dim), F32),
        "bv": s * jax.random.normal(ks[5], (1, embed_dim), F32),
        "wo": s * jax.random.normal(ks[6], (embed_dim, embed_dim), F32),
        "bo": jnp.zeros((1, embed_dim), F32),
        "lng": jnp.ones((1, embed_dim), F32),
        "lnb": jnp.zeros((1, embed_dim), F32),
        "w1": s * jax.random.normal(ks[7], (embed_dim, pf_dim), F32),
        "b1": jnp.zeros((1, pf_dim), F32),
        "w2": s * jax.random.normal(jax.random.fold_in(key, 99), (pf_dim, embed_dim), F32),
        "b2": jnp.zeros((1, embed_dim), F32),
    }


if __name__ == "__main__":
    B, S, E, H, PF = 2, 8, 32, 4, 64

    key = jax.random.PRNGKey(0)
    k_q, k_r, k_p = jax.random.split(key, 3)
    question = jax.random.normal(k_q, (B, S, E), F32)
    query = jax.random.normal(k_r, (B, S, E), F32)
    params = init_params(k_p, E, PF)

    out = cross_attention(question, query, params, heads=H)
    out = jax.block_until_ready(out)
    assert out.shape == (B, S, 2 * E), out.shape

    # Tight check against a pure-JAX reference with identical math / rounding.
    ref_matched = cross_attention_matched_reference(question, query, params, heads=H)
    err_matched = float(jnp.max(jnp.abs(out - ref_matched)))
    assert jnp.allclose(out, ref_matched, atol=1e-2, rtol=1e-2), err_matched

    # Looser sanity check against the exact f32 module reference (differences
    # here are only bf16-vs-f32 matmul precision from the requested bf16 path).
    ref_exact = cross_attention_reference(question, query, params, heads=H)
    err_exact = float(jnp.max(jnp.abs(out - ref_exact)))
    assert err_exact < 0.3, err_exact

    print("KERNEL_OK")
</pallas_src>

<mosaic_0001>
module attributes {stable_mosaic.version = 11 : i64} {
  func.func @cross_attention_kernel(%arg0: i32, %arg1: memref<16x32xf32, #tpu.memory_space<vmem>>, %arg2: memref<16x32xf32, #tpu.memory_space<vmem>>, %arg3: memref<32x96xbf16, #tpu.memory_space<vmem>>, %arg4: memref<1x96xf32, #tpu.memory_space<vmem>>, %arg5: memref<32x32xbf16, #tpu.memory_space<vmem>>, %arg6: memref<1x32xf32, #tpu.memory_space<vmem>>, %arg7: memref<1x32xf32, #tpu.memory_space<vmem>>, %arg8: memref<1x32xf32, #tpu.memory_space<vmem>>, %arg9: memref<32x64xbf16, #tpu.memory_space<vmem>>, %arg10: memref<1x64xf32, #tpu.memory_space<vmem>>, %arg11: memref<64x32xbf16, #tpu.memory_space<vmem>>, %arg12: memref<1x32xf32, #tpu.memory_space<vmem>>, %arg13: memref<32x32xf32, #tpu.memory_space<vmem>>, %arg14: memref<16x32xf32, #tpu.memory_space<vmem>>, %arg15: memref<16x32xf32, #tpu.memory_space<vmem>>) attributes {dimension_semantics = [#tpu.dimension_semantics<parallel>], iteration_bounds = array<i64: 1>, scalar_prefetch = 0 : i64, scratch_operands = 0 : i64, tpu.core_type = #tpu.core_type<tc>, window_params = [{transform_indices = @transform_0, window_bounds = array<i64: 16, 32>}, {transform_indices = @transform_1, window_bounds = array<i64: 16, 32>}, {pipeline_mode = #tpu.pipeline_mode<synchronous>, transform_indices = @transform_2, window_bounds = array<i64: 32, 96>}, {pipeline_mode = #tpu.pipeline_mode<synchronous>, transform_indices = @transform_3, window_bounds = array<i64: 1, 96>}, {pipeline_mode = #tpu.pipeline_mode<synchronous>, transform_indices = @transform_4, window_bounds = array<i64: 32, 32>}, {pipeline_mode = #tpu.pipeline_mode<synchronous>, transform_indices = @transform_5, window_bounds = array<i64: 1, 32>}, {pipeline_mode = #tpu.pipeline_mode<synchronous>, transform_indices = @transform_6, window_bounds = array<i64: 1, 32>}, {pipeline_mode = #tpu.pipeline_mode<synchronous>, transform_indices = @transform_7, window_bounds = array<i64: 1, 32>}, {pipeline_mode = #tpu.pipeline_mode<synchronous>, transform_indices = @transform_8, window_bounds = array<i64: 32, 64>}, {pipeline_mode = #tpu.pipeline_mode<synchronous>, transform_indices = @transform_9, window_bounds = array<i64: 1, 64>}, {pipeline_mode = #tpu.pipeline_mode<synchronous>, transform_indices = @transform_10, window_bounds = array<i64: 64, 32>}, {pipeline_mode = #tpu.pipeline_mode<synchronous>, transform_indices = @transform_11, window_bounds = array<i64: 1, 32>}, {pipeline_mode = #tpu.pipeline_mode<synchronous>, transform_indices = @transform_12, window_bounds = array<i64: 32, 32>}, {transform_indices = @transform_13, window_bounds = array<i64: 16, 32>}, {transform_indices = @transform_14, window_bounds = array<i64: 16, 32>}]} {
    %c0 = arith.constant 0 : index
    %c0_0 = arith.constant 0 : index
    %0 = vector.load %arg1[%c0, %c0_0] : memref<16x32xf32, #tpu.memory_space<vmem>>, vector<16x32xf32>
    %c0_1 = arith.constant 0 : index
    %c0_2 = arith.constant 0 : index
    %1 = vector.load %arg2[%c0_1, %c0_2] : memref<16x32xf32, #tpu.memory_space<vmem>>, vector<16x32xf32>
    %2 = vector.extract_strided_slice %0 {offsets = [0, 0], sizes = [8, 32], strides = [1, 1]} : vector<16x32xf32> to vector<8x32xf32>
    %3 = vector.extract_strided_slice %1 {offsets = [0, 0], sizes = [8, 32], strides = [1, 1]} : vector<16x32xf32> to vector<8x32xf32>
    %4 = vector.extract_strided_slice %0 {offsets = [8, 0], sizes = [8, 32], strides = [1, 1]} : vector<16x32xf32> to vector<8x32xf32>
    %5 = vector.extract_strided_slice %1 {offsets = [8, 0], sizes = [8, 32], strides = [1, 1]} : vector<16x32xf32> to vector<8x32xf32>
    %6 = tpu.concatenate %2, %3, %4, %5 in 0 : vector<8x32xf32>, vector<8x32xf32>, vector<8x32xf32>, vector<8x32xf32> -> vector<32x32xf32>
    %7 = arith.truncf %6 : vector<32x32xf32> to vector<32x32xbf16>
    %c0_3 = arith.constant 0 : index
    %c0_4 = arith.constant 0 : index
    %8 = vector.load %arg3[%c0_3, %c0_4] : memref<32x96xbf16, #tpu.memory_space<vmem>>, vector<32x96xbf16>
    %cst = arith.constant dense<0.000000e+00> : vector<32x96xf32>
    %9 = tpu.matmul %7, %8, %cst {dimension_numbers = #tpu.dot_dimension_numbers<[1], [0], [0], [1], [0, 0, 1, 1], [], []>} : vector<32x32xbf16>, vector<32x96xbf16>, vector<32x96xf32> -> vector<32x96xf32>
    %c0_5 = arith.constant 0 : index
    %c0_6 = arith.constant 0 : index
    %10 = vector.load %arg4[%c0_5, %c0_6] : memref<1x96xf32, #tpu.memory_space<vmem>>, vector<1x96xf32>
    %11 = vector.broadcast %10 : vector<1x96xf32> to vector<32x96xf32>
    %12 = arith.addf %9, %11 : vector<32x96xf32>
    %13 = vector.extract_strided_slice %12 {offsets = [0, 0], sizes = [32, 32], strides = [1, 1]} : vector<32x96xf32> to vector<32x32xf32>
    %14 = vector.extract_strided_slice %12 {offsets = [0, 32], sizes = [32, 32], strides = [1, 1]} : vector<32x96xf32> to vector<32x32xf32>
    %15 = vector.extract_strided_slice %12 {offsets = [0, 64], sizes = [32, 32], strides = [1, 1]} : vector<32x96xf32> to vector<32x32xf32>
    %c0_7 = arith.constant 0 : index
    %c0_8 = arith.constant 0 : index
    %16 = vector.load %arg13[%c0_7, %c0_8] : memref<32x32xf32, #tpu.memory_space<vmem>>, vector<32x32xf32>
    %17 = vector.extract_strided_slice %14 {offsets = [0, 0], sizes = [16, 32], strides = [1, 1]} : vector<32x32xf32> to vector<16x32xf32>
    %18 = vector.extract_strided_slice %15 {offsets = [0, 0], sizes = [16, 32], strides = [1, 1]} : vector<32x32xf32> to vector<16x32xf32>
    %19 = tpu.transpose %17, [1, 0] : vector<16x32xf32> -> vector<32x16xf32>
    %20 = arith.truncf %19 : vector<32x16xf32> to vector<32x16xbf16>
    %21 = arith.truncf %18 : vector<16x32xf32> to vector<16x32xbf16>
    %cst_9 = arith.constant dense<0.000000e+00> : vector<32x32xf32>
    %22 = tpu.matmul %20, %21, %cst_9 {dimension_numbers = #tpu.dot_dimension_numbers<[1], [0], [0], [1], [0, 0, 1, 1], [], []>} : vector<32x16xbf16>, vector<16x32xbf16>, vector<32x32xf32> -> vector<32x32xf32>
    %23 = arith.mulf %22, %16 : vector<32x32xf32>
    %24 = arith.truncf %23 : vector<32x32xf32> to vector<32x32xbf16>
    %25 = vector.extract_strided_slice %13 {offsets = [0, 0], sizes = [16, 32], strides = [1, 1]} : vector<32x32xf32> to vector<16x32xf32>
    %26 = arith.truncf %25 : vector<16x32xf32> to vector<16x32xbf16>
    %cst_10 = arith.constant dense<0.000000e+00> : vector<16x32xf32>
    %27 = tpu.matmul %26, %24, %cst_10 {dimension_numbers = #tpu.dot_dimension_numbers<[1], [0], [0], [1], [0, 0, 1, 1], [], []>} : vector<16x32xbf16>, vector<32x32xbf16>, vector<16x32xf32> -> vector<16x32xf32>
    %28 = vector.extract_strided_slice %14 {offsets = [16, 0], sizes = [16, 32], strides = [1, 1]} : vector<32x32xf32> to vector<16x32xf32>
    %29 = vector.extract_strided_slice %15 {offsets = [16, 0], sizes = [16, 32], strides = [1, 1]} : vector<32x32xf32> to vector<16x32xf32>
    %30 = tpu.transpose %28, [1, 0] : vector<16x32xf32> -> vector<32x16xf32>
    %31 = arith.truncf %30 : vector<32x16xf32> to vector<32x16xbf16>
    %32 = arith.truncf %29 : vector<16x32xf32> to vector<16x32xbf16>
    %cst_11 = arith.constant dense<0.000000e+00> : vector<32x32xf32>
    %33 = tpu.matmul %31, %32, %cst_11 {dimension_numbers = #tpu.dot_dimension_numbers<[1], [0], [0], [1], [0, 0, 1, 1], [], []>} : vector<32x16xbf16>, vector<16x32xbf16>, vector<32x32xf32> -> vector<32x32xf32>
    %34 = arith.mulf %33, %16 : vector<32x32xf32>
    %35 = arith.truncf %34 : vector<32x32xf32> to vector<32x32xbf16>
    %36 = vector.extract_strided_slice %13 {offsets = [16, 0], sizes = [16, 32], strides = [1, 1]} : vector<32x32xf32> to vector<16x32xf32>
    %37 = arith.truncf %36 : vector<16x32xf32> to vector<16x32xbf16>
    %cst_12 = arith.constant dense<0.000000e+00> : vector<16x32xf32>
    %38 = tpu.matmul %37, %35, %cst_12 {dimension_numbers = #tpu.dot_dimension_numbers<[1], [0], [0], [1], [0, 0, 1, 1], [], []>} : vector<16x32xbf16>, vector<32x32xbf16>, vector<16x32xf32> -> vector<16x32xf32>
    %39 = tpu.concatenate %27, %38 in 0 : vector<16x32xf32>, vector<16x32xf32> -> vector<32x32xf32>
    %c0_13 = arith.constant 0 : index
    %c0_14 = arith.constant 0 : index
    %40 = vector.load %arg7[%c0_13, %c0_14] : memref<1x32xf32, #tpu.memory_space<vmem>>, vector<1x32xf32>
    %c0_15 = arith.constant 0 : index
    %c0_16 = arith.constant 0 : index
    %41 = vector.load %arg8[%c0_15, %c0_16] : memref<1x32xf32, #tpu.memory_space<vmem>>, vector<1x32xf32>
    %42 = arith.truncf %39 : vector<32x32xf32> to vector<32x32xbf16>
    %c0_17 = arith.constant 0 : index
    %c0_18 = arith.constant 0 : index
    %43 = vector.load %arg5[%c0_17, %c0_18] : memref<32x32xbf16, #tpu.memory_space<vmem>>, vector<32x32xbf16>
    %cst_19 = arith.constant dense<0.000000e+00> : vector<32x32xf32>
    %44 = tpu.matmul %42, %43, %cst_19 {dimension_numbers = #tpu.dot_dimension_numbers<[1], [0], [0], [1], [0, 0, 1, 1], [], []>} : vector<32x32xbf16>, vector<32x32xbf16>, vector<32x32xf32> -> vector<32x32xf32>
    %c0_20 = arith.constant 0 : index
    %c0_21 = arith.constant 0 : index
    %45 = vector.load %arg6[%c0_20, %c0_21] : memref<1x32xf32, #tpu.memory_space<vmem>>, vector<1x32xf32>
    %46 = vector.broadcast %45 : vector<1x32xf32> to vector<32x32xf32>
    %47 = arith.addf %44, %46 : vector<32x32xf32>
    %48 = arith.addf %6, %47 : vector<32x32xf32>
    %cst_22 = arith.constant dense<0.000000e+00> : vector<32xf32>
    %49 = vector.multi_reduction <add>, %48, %cst_22 [1] : vector<32x32xf32> to vector<32xf32>
    %50 = vector.shape_cast %49 : vector<32xf32> to vector<32x1xf32>
    %cst_23 = arith.constant 3.200000e+01 : f32
    %51 = vector.broadcast %cst_23 : f32 to vector<32x1xf32>
    %52 = arith.divf %50, %51 : vector<32x1xf32>
    %53 = vector.broadcast %52 : vector<32x1xf32> to vector<32x32xf32>
    %54 = arith.subf %48, %53 : vector<32x32xf32>
    %55 = arith.mulf %54, %54 : vector<32x32xf32>
    %cst_24 = arith.constant dense<0.000000e+00> : vector<32xf32>
    %56 = vector.multi_reduction <add>, %55, %cst_24 [1] : vector<32x32xf32> to vector<32xf32>
    %57 = vector.shape_cast %56 : vector<32xf32> to vector<32x1xf32>
    %cst_25 = arith.constant 3.200000e+01 : f32
    %58 = vector.broadcast %cst_25 : f32 to vector<32x1xf32>
    %59 = arith.divf %57, %58 : vector<32x1xf32>
    %60 = vector.broadcast %52 : vector<32x1xf32> to vector<32x32xf32>
    %61 = arith.subf %48, %60 : vector<32x32xf32>
    %cst_26 = arith.constant 9.99999974E-6 : f32
    %62 = vector.broadcast %cst_26 : f32 to vector<32x1xf32>
    %63 = arith.addf %59, %62 : vector<32x1xf32>
    %64 = math.rsqrt %63 : vector<32x1xf32>
    %65 = vector.broadcast %64 : vector<32x1xf32> to vector<32x32xf32>
    %66 = arith.mulf %61, %65 : vector<32x32xf32>
    %67 = vector.broadcast %40 : vector<1x32xf32> to vector<32x32xf32>
    %68 = arith.mulf %66, %67 : vector<32x32xf32>
    %69 = vector.broadcast %41 : vector<1x32xf32> to vector<32x32xf32>
    %70 = arith.addf %68, %69 : vector<32x32xf32>
    %71 = arith.truncf %70 : vector<32x32xf32> to vector<32x32xbf16>
    %c0_27 = arith.constant 0 : index
    %c0_28 = arith.constant 0 : index
    %72 = vector.load %arg9[%c0_27, %c0_28] : memref<32x64xbf16, #tpu.memory_space<vmem>>, vector<32x64xbf16>
    %cst_29 = arith.constant dense<0.000000e+00> : vector<32x64xf32>
    %73 = tpu.matmul %71, %72, %cst_29 {dimension_numbers = #tpu.dot_dimension_numbers<[1], [0], [0], [1], [0, 0, 1, 1], [], []>} : vector<32x32xbf16>, vector<32x64xbf16>, vector<32x64xf32> -> vector<32x64xf32>
    %c0_30 = arith.constant 0 : index
    %c0_31 = arith.constant 0 : index
    %74 = vector.load %arg10[%c0_30, %c0_31] : memref<1x64xf32, #tpu.memory_space<vmem>>, vector<1x64xf32>
    %75 = vector.broadcast %74 : vector<1x64xf32> to vector<32x64xf32>
    %76 = arith.addf %73, %75 : vector<32x64xf32>
    %cst_32 = arith.constant 0.000000e+00 : f32
    %77 = vector.broadcast %cst_32 : f32 to vector<32x64xf32>
    %78 = arith.maximumf %76, %77 : vector<32x64xf32>
    %79 = arith.truncf %78 : vector<32x64xf32> to vector<32x64xbf16>
    %c0_33 = arith.constant 0 : index
    %c0_34 = arith.constant 0 : index
    %80 = vector.load %arg11[%c0_33, %c0_34] : memref<64x32xbf16, #tpu.memory_space<vmem>>, vector<64x32xbf16>
    %cst_35 = arith.constant dense<0.000000e+00> : vector<32x32xf32>
    %81 = tpu.matmul %79, %80, %cst_35 {dimension_numbers = #tpu.dot_dimension_numbers<[1], [0], [0], [1], [0, 0, 1, 1], [], []>} : vector<32x64xbf16>, vector<64x32xbf16>, vector<32x32xf32> -> vector<32x32xf32>
    %c0_36 = arith.constant 0 : index
    %c0_37 = arith.constant 0 : index
    %82 = vector.load %arg12[%c0_36, %c0_37] : memref<1x32xf32, #tpu.memory_space<vmem>>, vector<1x32xf32>
    %83 = vector.broadcast %82 : vector<1x32xf32> to vector<32x32xf32>
    %84 = arith.addf %81, %83 : vector<32x32xf32>
    %85 = arith.addf %70, %84 : vector<32x32xf32>
    %cst_38 = arith.constant dense<0.000000e+00> : vector<32xf32>
    %86 = vector.multi_reduction <add>, %85, %cst_38 [1] : vector<32x32xf32> to vector<32xf32>
    %87 = vector.shape_cast %86 : vector<32xf32> to vector<32x1xf32>
    %cst_39 = arith.constant 3.200000e+01 : f32
    %88 = vector.broadcast %cst_39 : f32 to vector<32x1xf32>
    %89 = arith.divf %87, %88 : vector<32x1xf32>
    %90 = vector.broadcast %89 : vector<32x1xf32> to vector<32x32xf32>
    %91 = arith.subf %85, %90 : vector<32x32xf32>
    %92 = arith.mulf %91, %91 : vector<32x32xf32>
    %cst_40 = arith.constant dense<0.000000e+00> : vector<32xf32>
    %93 = vector.multi_reduction <add>, %92, %cst_40 [1] : vector<32x32xf32> to vector<32xf32>
    %94 = vector.shape_cast %93 : vector<32xf32> to vector<32x1xf32>
    %cst_41 = arith.constant 3.200000e+01 : f32
    %95 = vector.broadcast %cst_41 : f32 to vector<32x1xf32>
    %96 = arith.divf %94, %95 : vector<32x1xf32>
    %97 = vector.broadcast %89 : vector<32x1xf32> to vector<32x32xf32>
    %98 = arith.subf %85, %97 : vector<32x32xf32>
    %cst_42 = arith.constant 9.99999974E-6 : f32
    %99 = vector.broadcast %cst_42 : f32 to vector<32x1xf32>
    %100 = arith.addf %96, %99 : vector<32x1xf32>
    %101 = math.rsqrt %100 : vector<32x1xf32>
    %102 = vector.broadcast %101 : vector<32x1xf32> to vector<32x32xf32>
    %103 = arith.mulf %98, %102 : vector<32x32xf32>
    %104 = vector.broadcast %40 : vector<1x32xf32> to vector<32x32xf32>
    %105 = arith.mulf %103, %104 : vector<32x32xf32>
    %106 = vector.broadcast %41 : vector<1x32xf32> to vector<32x32xf32>
    %107 = arith.addf %105, %106 : vector<32x32xf32>
    %108 = vector.extract_strided_slice %107 {offsets = [0, 0], sizes = [8, 32], strides = [1, 1]} : vector<32x32xf32> to vector<8x32xf32>
    %c0_43 = arith.constant 0 : index
    %c0_44 = arith.constant 0 : index
    %109 = vector.load %arg14[%c0_43, %c0_44] : memref<16x32xf32, #tpu.memory_space<vmem>>, vector<8x32xf32>
    tpu.vector_store %arg14[%c0_43, %c0_44], %108 {strides = array<i32>} : memref<16x32xf32, #tpu.memory_space<vmem>>, vector<8x32xf32>,
    %110 = vector.extract_strided_slice %107 {offsets = [8, 0], sizes = [8, 32], strides = [1, 1]} : vector<32x32xf32> to vector<8x32xf32>
    %c0_45 = arith.constant 0 : index
    %c0_46 = arith.constant 0 : index
    %111 = vector.load %arg15[%c0_45, %c0_46] : memref<16x32xf32, #tpu.memory_space<vmem>>, vector<8x32xf32>
    tpu.vector_store %arg15[%c0_45, %c0_46], %110 {strides = array<i32>} : memref<16x32xf32, #tpu.memory_space<vmem>>, vector<8x32xf32>,
    %112 = vector.extract_strided_slice %107 {offsets = [16, 0], sizes = [8, 32], strides = [1, 1]} : vector<32x32xf32> to vector<8x32xf32>
    %c8 = arith.constant 8 : index
    %c0_47 = arith.constant 0 : index
    %113 = vector.load %arg14[%c8, %c0_47] : memref<16x32xf32, #tpu.memory_space<vmem>>, vector<8x32xf32>
    tpu.vector_store %arg14[%c8, %c0_47], %112 {strides = array<i32>} : memref<16x32xf32, #tpu.memory_space<vmem>>, vector<8x32xf32>,
    %114 = vector.extract_strided_slice %107 {offsets = [24, 0], sizes = [8, 32], strides = [1, 1]} : vector<32x32xf32> to vector<8x32xf32>
    %c8_48 = arith.constant 8 : index
    %c0_49 = arith.constant 0 : index
    %115 = vector.load %arg15[%c8_48, %c0_49] : memref<16x32xf32, #tpu.memory_space<vmem>>, vector<8x32xf32>
    tpu.vector_store %arg15[%c8_48, %c0_49], %114 {strides = array<i32>} : memref<16x32xf32, #tpu.memory_space<vmem>>, vector<8x32xf32>,
    return
  }
  func.func @transform_0(%arg0: i32) -> (i32, i32) {
    %c0_i32 = arith.constant 0 : i32
    %c0_i32_0 = arith.constant 0 : i32
    return %arg0, %c0_i32 : i32, i32
  }
  func.func @transform_1(%arg0: i32) -> (i32, i32) {
    %c0_i32 = arith.constant 0 : i32
    %c0_i32_0 = arith.constant 0 : i32
    return %arg0, %c0_i32 : i32, i32
  }
  func.func @transform_2(%arg0: i32) -> (i32, i32) {
    %c0_i32 = arith.constant 0 : i32
    %c0_i32_0 = arith.constant 0 : i32
    %c0_i32_1 = arith.constant 0 : i32
    return %c0_i32, %c0_i32_0 : i32, i32
  }
  func.func @transform_3(%arg0: i32) -> (i32, i32) {
    %c0_i32 = arith.constant 0 : i32
    %c0_i32_0 = arith.constant 0 : i32
    %c0_i32_1 = arith.constant 0 : i32
    return %c0_i32, %c0_i32_0 : i32, i32
  }
  func.func @transform_4(%arg0: i32) -> (i32, i32) {
    %c0_i32 = arith.constant 0 : i32
    %c0_i32_0 = arith.constant 0 : i32
    %c0_i32_1 = arith.constant 0 : i32
    return %c0_i32, %c0_i32_0 : i32, i32
  }
  func.func @transform_5(%arg0: i32) -> (i32, i32) {
    %c0_i32 = arith.constant 0 : i32
    %c0_i32_0 = arith.constant 0 : i32
    %c0_i32_1 = arith.constant 0 : i32
    return %c0_i32, %c0_i32_0 : i32, i32
  }
  func.func @transform_6(%arg0: i32) -> (i32, i32) {
    %c0_i32 = arith.constant 0 : i32
    %c0_i32_0 = arith.constant 0 : i32
    %c0_i32_1 = arith.constant 0 : i32
    return %c0_i32, %c0_i32_0 : i32, i32
  }
  func.func @transform_7(%arg0: i32) -> (i32, i32) {
    %c0_i32 = arith.constant 0 : i32
    %c0_i32_0 = arith.constant 0 : i32
    %c0_i32_1 = arith.constant 0 : i32
    return %c0_i32, %c0_i32_0 : i32, i32
  }
  func.func @transform_8(%arg0: i32) -> (i32, i32) {
    %c0_i32 = arith.constant 0 : i32
    %c0_i32_0 = arith.constant 0 : i32
    %c0_i32_1 = arith.constant 0 : i32
    return %c0_i32, %c0_i32_0 : i32, i32
  }
  func.func @transform_9(%arg0: i32) -> (i32, i32) {
    %c0_i32 = arith.constant 0 : i32
    %c0_i32_0 = arith.constant 0 : i32
    %c0_i32_1 = arith.constant 0 : i32
    return %c0_i32, %c0_i32_0 : i32, i32
  }
  func.func @transform_10(%arg0: i32) -> (i32, i32) {
    %c0_i32 = arith.constant 0 : i32
    %c0_i32_0 = arith.constant 0 : i32
    %c0_i32_1 = arith.constant 0 : i32
    return %c0_i32, %c0_i32_0 : i32, i32
  }
  func.func @transform_11(%arg0: i32) -> (i32, i32) {
    %c0_i32 = arith.constant 0 : i32
    %c0_i32_0 = arith.constant 0 : i32
    %c0_i32_1 = arith.constant 0 : i32
    return %c0_i32, %c0_i32_0 : i32, i32
  }
  func.func @transform_12(%arg0: i32) -> (i32, i32) {
    %c0_i32 = arith.constant 0 : i32
    %c0_i32_0 = arith.constant 0 : i32
    %c0_i32_1 = arith.constant 0 : i32
    return %c0_i32, %c0_i32_0 : i32, i32
  }
  func.func @transform_13(%arg0: i32) -> (i32, i32) {
    %c0_i32 = arith.constant 0 : i32
    %c0_i32_0 = arith.constant 0 : i32
    return %arg0, %c0_i32 : i32, i32
  }
  func.func @transform_14(%arg0: i32) -> (i32, i32) {
    %c0_i32 = arith.constant 0 : i32
    %c0_i32_0 = arith.constant 0 : i32
    return %arg0, %c0_i32 : i32, i32
  }
}

</mosaic_0001>

<bundles_post_ra>
// kernel: tpu_custom_call.1
= control target key start
LH: loop header
LB: loop body
LE: loop exit
PB: predicated region body
PF: predicated region fallthrough
CT: control target
= control target key end

     0   :  { %20 = vsyncpa [#allocation3], 0  ;;  %s1562_s0 = inlined_call_operand.vmem [shape: f32[16,32], index: 0, kind: input, shape index: {}]   ;;  %s1563_s1 = inlined_call_operand.hbm [shape: f32[16,32], index: 1, kind: input, shape index: {}]   ;;  %s1564_s2 = inlined_call_operand.hbm [shape: bf16[32,96], index: 2, kind: input, shape index: {}]   ;;  %s1565_s3 = inlined_call_operand.vmem [shape: f32[1,96], index: 3, kind: input, shape index: {}]   ;;  %s1566_s4 = inlined_call_operand.hbm [shape: bf16[32,32], index: 4, kind: input, shape index: {}]   ;;  %s1567_s5 = inlined_call_operand.vmem [shape: f32[1,32], index: 5, kind: input, shape index: {}]   ;;  %s1568_s6 = inlined_call_operand.vmem [shape: f32[1,32], index: 6, kind: input, shape index: {}]   ;;  %s1569_s7 = inlined_call_operand.vmem [shape: f32[1,32], index: 7, kind: input, shape index: {}]   ;;  %s1570_s8 = inlined_call_operand.hbm [shape: bf16[32,64], index: 8, kind: input, shape index: {}]   ;;  %s1571_s9 = inlined_call_operand.vmem [shape: f32[1,64], index: 9, kind: input, shape index: {}]   ;;  %s1572_s10 = inlined_call_operand.vmem [shape: bf16[64,32], index: 10, kind: input, shape index: {}]   ;;  %s1573_s11 = inlined_call_operand.vmem [shape: f32[1,32], index: 11, kind: input, shape index: {}]   ;;  %s1574_s12 = inlined_call_operand.vmem [shape: f32[32,32], index: 12, kind: input, shape index: {}]   ;;  %s1575_s13 = inlined_call_operand.hbm [shape: f32[16,32], index: 13, kind: output, shape index: {0}]   ;;  %s1576_s14 = inlined_call_operand.hbm [shape: f32[16,32], index: 14, kind: output, shape index: {1}]  }
   0x1   :  { %21 = vsyncpa [#allocation6], 0 }
   0x2   :  { %22 = vsyncpa [#allocation9], 0 }
   0x3   :  { %23 = vsyncpa [#allocation4], 0 }
   0x4   :  { %24 = vsyncpa [#allocation12], 0  ;;  %s1246_s29 = smov [#allocation5]   ;;  %s1104_s17 = scalar_lea.hbm %s1564_s2, 256 }
   0x5   :  { %s44_s30 = sshll.u32 %s1246_s29, 4  ;;  %p1105_p0 = scmp.ne.s32.totalorder %s1564_s2, %s1104_s17  ;;  %s45_s30 = int_to_ptr.vmem [resolvable:$true] %s44_s30 }
   0x6   :  { %p1108_p1 = scmp.lt.u32.totalorder %s1104_s17, %s1564_s2 }
   0x8   :  { %p1110_p2 = pnand %p1108_p1, %p1105_p0 }
   0xa   :  { %1113 = shalt.err (!%p1110_p2)
}
   0xb   :  { %s1114_s22 = scalar_lea.vmem %s45_s30, 256  ;;  %p1119_p4 = scmp.lt.s32.totalorder %s45_s30, %s45_s30 }
   0xc   :  { %p1115_p3 = scmp.ne.s32.totalorder %s45_s30, %s1114_s22  ;;  %p1120_p5 = scmp.lt.s32.totalorder %s1114_s22, %s1114_s22 }
   0xe   :  { %p1121_p6 = por %p1120_p5, %p1119_p4 }
  0x10   :  { %p1122_p7 = pnand %p1121_p6, %p1115_p3 }
  0x12   :  { %1125 = shalt.err (!%p1122_p7)
}
  0x13   :  { %s1577_s23 = smov 64   ;;  %s1248_s24 = smov 4  }
  0x14   :  { %50 = dma.hbm_to_vmem [thread:$0]  %s1564_s2, 256, %s45_s30, [#allocation6], %s1577_s23, %s1577_s23, %s1248_s24  }
  0x15   :  { %s1249_s27 = smov [#allocation2]   ;;  %s1126_s16 = scalar_lea.hbm %s1563_s1, 256 }
  0x16   :  { %s32_s28 = sshll.u32 %s1249_s27, 4  ;;  %p1127_p8 = scmp.ne.s32.totalorder %s1563_s1, %s1126_s16  ;;  %s33_s28 = int_to_ptr.vmem [resolvable:$true] %s32_s28 }
  0x17   :  { %p1130_p9 = scmp.lt.u32.totalorder %s1126_s16, %s1563_s1 }
  0x19   :  { %p1132_p10 = pnand %p1130_p9, %p1127_p8 }
  0x1b   :  { %1135 = shalt.err (!%p1132_p10)
}
  0x1c   :  { %s1136_s21 = scalar_lea.vmem %s33_s28, 256  ;;  %p1141_p12 = scmp.lt.s32.totalorder %s33_s28, %s33_s28 }
  0x1d   :  { %p1137_p11 = scmp.ne.s32.totalorder %s33_s28, %s1136_s21  ;;  %p1142_p13 = scmp.lt.s32.totalorder %s1136_s21, %s1136_s21 }
  0x1f   :  { %p1143_p0 = por %p1142_p13, %p1141_p12 }
  0x21   :  { %p1144_p1 = pnand %p1143_p0, %p1137_p11 }
  0x23   :  { %1147 = shalt.err (!%p1144_p1)
}
  0x24   :  { %s1250_s2 = smov 128   ;;  %s1251_s30 = smov 8  }
  0x25   :  { %38 = dma.hbm_to_vmem [thread:$0]  %s1563_s1, 256, %s33_s28, [#allocation3], %s1250_s2, %s1250_s2, %s1251_s30  }
  0x26   :  { %s1252_s26 = smov [#allocation7]   ;;  %s1253_s29 = smov [#allocation8]  }
  0x27   :  { %s58_s27 = sshll.u32 %s1252_s26, 4  ;;  %s76_s15 = sshll.u32 %s1253_s29, 4  ;;  %s59_s27 = int_to_ptr.vmem [resolvable:$true] %s58_s27  ;;  %s1364_s15 = int_to_ptr.vmem [resolvable:$true] %s76_s15 }
  0x28   :  { %s1148_s18 = scalar_lea.hbm %s1566_s4, 256 }
  0x29   :  { %p1149_p2 = scmp.ne.s32.totalorder %s1566_s4, %s1148_s18  ;;  %p1152_p3 = scmp.lt.u32.totalorder %s1148_s18, %s1566_s4 }
  0x2b   :  { %p1154_p4 = pnand %p1152_p3, %p1149_p2 }
  0x2d   :  { %1157 = shalt.err (!%p1154_p4)
}
  0x2e   :  { %s1158_s1 = scalar_lea.vmem %s59_s27, 256  ;;  %p1163_p6 = scmp.lt.s32.totalorder %s59_s27, %s59_s27 }
  0x2f   :  { %p1159_p5 = scmp.ne.s32.totalorder %s59_s27, %s1158_s1  ;;  %p1164_p7 = scmp.lt.s32.totalorder %s1158_s1, %s1158_s1 }
  0x31   :  { %p1165_p8 = por %p1164_p7, %p1163_p6 }
  0x33   :  { %p1166_p9 = pnand %p1165_p8, %p1159_p5 }
  0x35   :  { %1169 = shalt.err (!%p1166_p9)
}
  0x36   :  { %s1579_s28 = smov 64   ;;  %s1170_s23 = scalar_lea.hbm %s1570_s8, 256 }
  0x37   :  { %64 = dma.hbm_to_vmem [thread:$0]  %s1566_s4, 256, %s59_s27, [#allocation6], %s1579_s28, %s1579_s28, %s1248_s24  }
  0x38   :  { %p1171_p10 = scmp.ne.s32.totalorder %s1570_s8, %s1170_s23  ;;  %p1174_p11 = scmp.lt.u32.totalorder %s1170_s23, %s1570_s8 }
  0x3a   :  { %p1176_p12 = pnand %p1174_p11, %p1171_p10 }
  0x3c   :  { %1179 = shalt.err (!%p1176_p12)
}
  0x3d   :  { %s1180_s20 = scalar_lea.vmem %s1364_s15, 256  ;;  %p1185_p0 = scmp.lt.s32.totalorder %s1364_s15, %s1364_s15 }
  0x3e   :  { %p1181_p13 = scmp.ne.s32.totalorder %s1364_s15, %s1180_s20  ;;  %p1186_p1 = scmp.lt.s32.totalorder %s1180_s20, %s1180_s20 }
  0x40   :  { %p1187_p2 = por %p1186_p1, %p1185_p0 }
  0x42   :  { %p1188_p3 = pnand %p1187_p2, %p1181_p13 }
  0x44   :  { %1191 = shalt.err (!%p1188_p3)
}
  0x45   :  { %82 = dma.hbm_to_vmem [thread:$0]  %s1570_s8, 256, %s1364_s15, [#allocation9], %s1579_s28, %s1579_s28, %s1248_s24  }
  0x46   :  { %1236 = dma.done.wait [#allocation3], 256  }
  0x47   :  { %1237 = vsyncadd [#allocation3], 4294967040 }
  0x48   :  { %1238 = dma.done.wait [#allocation6], 512  }
  0x49   :  { %1239 = vsyncadd [#allocation6], 4294966784 }
  0x4a   :  { %1240 = dma.done.wait [#allocation9], 256  }
  0x4b   :  { %1241 = vsyncadd [#allocation9], 4294967040  ;;  %v1078_v0 = vld [vmem:[#allocation5] sm:$0xff]   ;;  %v1079_v1 = vld [vmem:[#allocation5 + $0x8] sm:$0xff]   ;;  %vm133_vm0 = vcmask 261120   ;;  %vm240_vm1 = vcmask 130048  }
  0x4c   :  { %1001 = vmatprep.subr.bf16.mxu0 %v1078_v0  ;;  %v1404_v2 = vld [vmem:[%s1562_s0] sm:$0xff]  ;;  %v1411_v4 = vld [vmem:[%s1562_s0 + $0x8] sm:$0xff]  ;;  %s1254_s0 = smov 96   ;;  %v1255_v30 = vmov 0.0   ;;  %vm1256_vm2 = vmmov 0   ;;  %v191_v32 = vld [vmem:[%s1574_s12 + $0x10] sm:$0xff] }
  0x4d   :  { %v1406_v3 = vld [vmem:[#allocation2] sm:$0xff]  ;;  %1002 = vmatpush3.bf16.msra.mxu0 %v1078_v0  ;;  %v1415_v6 = vld [vmem:[#allocation2 + $0x8] sm:$0xff]  ;;  %v192_v34 = vld [vmem:[%s1574_s12 + $0x18] sm:$0xff]  ;;  %vm782_vm3 = vcmask 523264   ;;  %s1258_s15 = smov [#allocation11]  }
  0x4e   :  { %v108_v5 = vpack.c.bf16 %v1406_v3, %v1404_v2  ;;  %1003 = vmatprep.subr.bf16.mxu0 %v1079_v1  ;;  %v109_v7 = vpack.c.bf16 %v1415_v6, %v1411_v4  ;;  %v941_v8 = vld [vmem:[%s1565_s3] ss:$0 sm:$0xff]  ;;  %v190_v38 = vld [vmem:[%s1574_s12 + $0x8] sm:$0xff] }
  0x4f   :  { %v189_v36 = vld [vmem:[%s1574_s12] sm:$0xff] }
  0x50   :  { %1005 = vmatprep.mubr.msk.bf16.mxu0 %vm133_vm0, %v108_v5  ;;  %v1080_v52 = vld [vmem:[#allocation7] sm:$0xff]  }
  0x51   :  { %1004 = vmatpush3.bf16.msra.mxu0 %v1079_v1 }
  0x52   :  { %1037 = vmatprep.subr.bf16.mxu0 %v1080_v52 }
  0x54   :  { %1006 = vmatmul.mubr.msk.bf16.vlgmr.msra.gmra.mrb[0].mxu0 %vm133_vm0, %v109_v7 }
  0x55   :  { %1038 = vmatpush3.bf16.msra.mxu0 %v1080_v52 }
 0x127   :  { %v1007_v9 = vpop.f32.mrb[0].mxu0 }
 0x128   :  { %v174_v10 = vpop.f32.mrb[1].mxu0  ;;  %v183_v13 = vadd.f32 %v1007_v9, %v941_v8 }
 0x129   :  { %v175_v11 = vadd.f32 %v941_v8, %v174_v10  ;;  %v1008_v12 = vpop.f32.mrb[2].mxu0 }
 0x12a   :  { %v186_v14 = vadd.f32 %v1008_v12, %v941_v8  ;;  %v177_v15 = vpop.f32.mrb[3].mxu0 }
 0x12b   :  { %v178_v16 = vadd.f32 %v941_v8, %v177_v15  ;;  %195 = vrot.lane.b32.xlu0 %v175_v11, %s1254_s0  ;;  %v1081_v8 = vld [vmem:[#allocation7 + $0x8] sm:$0xff]  }
 0x12c   :  { %v1424_v17 = vpack.c.bf16 %v186_v14, %v183_v13  ;;  %1039 = vmatprep.subr.bf16.mxu0 %v1081_v8 }
 0x12d   :  { %v235_v18 = vpack.c.bf16 %v178_v16, %v175_v11  ;;  %1040 = vmatpush3.bf16.msra.mxu0 %v1081_v8 }
 0x12f   :  { %197 = vrot.lane.b32.xlu0 %v178_v16, %s1254_s0  ;;  %237 = vrot.lane.b32.xlu1 %v235_v18, %s1579_s28 }
 0x133   :  { %348 = vrot.lane.b32.xlu0 %v183_v13, %s1254_s0 }
 0x137   :  { %350 = vrot.lane.b32.xlu0 %v186_v14, %s1254_s0  ;;  %v952_v14 = vld [vmem:[%s1567_s5] ss:$0 sm:$0xff] }
 0x13b   :  { %390 = vrot.lane.b32.xlu0 %v1424_v17, %s1579_s28  ;;  %s923_s28 = sshll.u32 %s1258_s15, 4  ;;  %s1524_s28 = int_to_ptr.vmem [resolvable:$true] %s923_s28 }
 0x19d   :  { %v196_v19 = vpop.permute.xlu0 %195 }
 0x19e   :  { %201 = vxpose.xlu1.b32.start [1/2] (short) (narrow) %v196_v19, 32 }
 0x1a1   :  { %v198_v20 = vpop.permute.xlu0 %197  ;;  %v238_v21 = vpop.permute.xlu1 %237 }
 0x1a2   :  { %202 = vxpose.xlu1.b32.end [2/2] (short) (narrow) %v198_v20, 32  ;;  %1009 = vmatprep.subr.bf16.mxu1 %v238_v21 }
 0x1a3   :  { %1010 = vmatpush3.bf16.msra.mxu1 %v238_v21 }
 0x1a4   :  { %1015 = vmatprep.subr.bf16.mxu1 %v1255_v30 }
 0x1a5   :  { %v349_v22 = vpop.permute.xlu0 %348 }
 0x1a6   :  { %354 = vxpose.xlu0.b32.start [1/2] (short) (narrow) %v349_v22, 32 }
 0x1a9   :  { %v351_v23 = vpop.permute.xlu0 %350 }
 0x1aa   :  { %355 = vxpose.xlu0.b32.end [2/2] (short) (narrow) %v351_v23, 32 }
 0x1ad   :  { %v391_v31 = vpop.permute.xlu0 %390 }
 0x21e   :  { %v217_v24 = vpop.trf.xlu1 }
 0x222   :  { %v218_v25 = vpop.trf.xlu1 }
 0x223   :  { %v233_v26 = vpack.c.bf16 %v218_v25, %v217_v24 }
 0x225   :  { %1011 = vmatprep.mubr.msk.bf16.mxu1 %vm240_vm1, %v233_v26 }
 0x226   :  { %v219_v27 = vpop.trf.xlu1  ;;  %v370_v35 = vpop.trf.xlu0 }
 0x22a   :  { %v220_v28 = vpop.trf.xlu1  ;;  %v371_v47 = vpop.trf.xlu0 }
 0x22b   :  { %v234_v29 = vpack.c.bf16 %v220_v28, %v219_v27  ;;  %v386_v49 = vpack.c.bf16 %v371_v47, %v370_v35  ;;  %v1082_v47 = vld [vmem:[#allocation8] sm:$0xff]  }
 0x22d   :  { %1012 = vmatmul.mubr.msk.bf16.vlgmr.msra.gmra.mrb[0].mxu1 %vm240_vm1, %v234_v29 }
 0x22e   :  { %1019 = vmatprep.mubr.msk.bf16.mxu1 %vm1256_vm2, %v1255_v30  ;;  %v372_v48 = vpop.trf.xlu0 }
 0x232   :  { %v373_v50 = vpop.trf.xlu0 }
 0x233   :  { %v387_v51 = vpack.c.bf16 %v373_v50, %v372_v48  ;;  %v1083_v48 = vld [vmem:[#allocation8 + $0x8] sm:$0xff]   ;;  %v1085_v50 = vld [vmem:[%s1572_s10 + $0x8] sm:$0xff]  }
 0x300   :  { %v1013_v33 = vpop.f32.mrb[0].mxu1 }
 0x301   :  { %v281_v37 = vpop.f32.mrb[1].mxu1  ;;  %v298_v40 = vmul.f32 %v1013_v33, %v191_v32 }
 0x302   :  { %v1014_v39 = vpop.f32.mrb[2].mxu1  ;;  %v296_v43 = vmul.f32 %v281_v37, %v189_v36 }
 0x303   :  { %v299_v41 = vmul.f32 %v1014_v39, %v192_v34  ;;  %v284_v42 = vpop.f32.mrb[3].mxu1 }
 0x304   :  { %v297_v44 = vmul.f32 %v284_v42, %v190_v38 }
 0x305   :  { %v301_v45 = vpack.c.bf16 %v299_v41, %v298_v40 }
 0x306   :  { %v300_v46 = vpack.c.bf16 %v297_v44, %v296_v43 }
 0x308   :  { %1016 = vmatpush3.bf16.msra.mxu1 %v300_v46 }
 0x309   :  { %1017 = vmatprep.subr.bf16.mxu1 %v1255_v30 }
 0x30c   :  { %1018 = vmatpush3.bf16.msra.mxu1 %v301_v45 }
 0x30d   :  { %1023 = vmatprep.subr.bf16.mxu1 %v391_v31 }
 0x30f   :  { %1020 = vmatmul.mubr.msk.bf16.vlgmr.msra.gmra.mrb[4].mxu1 %vm133_vm0, %v235_v18 }
 0x310   :  { %1024 = vmatpush3.bf16.msra.mxu1 %v391_v31  ;;  %1025 = vmatprep.mubr.msk.bf16.mxu1 %vm240_vm1, %v386_v49  ;;  %v1084_v49 = vld [vmem:[%s1572_s10] sm:$0xff]  }
 0x311   :  { %1029 = vmatprep.subr.bf16.mxu1 %v1255_v30  ;;  %1053 = vmatprep.subr.bf16.mxu0 %v1084_v49 }
 0x317   :  { %1026 = vmatmul.mubr.msk.bf16.vlgmr.msra.gmra.mrb[8].mxu1 %vm240_vm1, %v387_v51 }
 0x318   :  { %1033 = vmatprep.mubr.msk.bf16.mxu1 %vm1256_vm2, %v1255_v30 }
 0x3e2   :  { %v339_v53 = vpop.f32.mrb[4].mxu1 }
 0x3e3   :  { %v1021_v54 = vpop.f32.mrb[5].mxu1 }
 0x3e4   :  { %v342_v55 = vpop.f32.mrb[6].mxu1 }
 0x3e5   :  { %v500_v56 = vpack.c.bf16 %v342_v55, %v339_v53  ;;  %v1022_v57 = vpop.f32.mrb[7].mxu1 }
 0x3e7   :  { %1041 = vmatprep.mubr.msk.bf16.mxu0 %vm133_vm0, %v500_v56 }
 0x3ea   :  { %v1027_v58 = vpop.f32.mrb[8].mxu1 }
 0x3eb   :  { %v433_v59 = vpop.f32.mrb[9].mxu1  ;;  %v450_v61 = vmul.f32 %v1027_v58, %v191_v32 }
 0x3ec   :  { %v1028_v60 = vpop.f32.mrb[10].mxu1  ;;  %v448_v0 = vmul.f32 %v433_v59, %v189_v36 }
 0x3ed   :  { %v451_v62 = vmul.f32 %v1028_v60, %v192_v34  ;;  %v436_v63 = vpop.f32.mrb[11].mxu1 }
 0x3ee   :  { %v449_v1 = vmul.f32 %v436_v63, %v190_v38 }
 0x3ef   :  { %v453_v5 = vpack.c.bf16 %v451_v62, %v450_v61 }
 0x3f0   :  { %v452_v7 = vpack.c.bf16 %v449_v1, %v448_v0  ;;  %v1476_v0 = vld [vmem:[%s1568_s6] ss:$0 sm:$0xff] }
 0x3f2   :  { %1030 = vmatpush3.bf16.msra.mxu1 %v452_v7 }
 0x3f3   :  { %1031 = vmatprep.subr.bf16.mxu1 %v1255_v30 }
 0x3f6   :  { %1032 = vmatpush3.bf16.msra.mxu1 %v453_v5 }
 0x3f7   :  { %1045 = vmatprep.subr.bf16.mxu1 %v1082_v47 }
 0x3f9   :  { %1034 = vmatmul.mubr.msk.bf16.vlgmr.msra.gmra.mrb[12].mxu1 %vm133_vm0, %v1424_v17 }
 0x3fa   :  { %1046 = vmatpush3.bf16.msra.mxu1 %v1082_v47 }
 0x3fb   :  { %1047 = vmatprep.subr.bf16.mxu1 %v1083_v48 }
 0x3fe   :  { %1048 = vmatpush3.bf16.msra.mxu1 %v1083_v48 }
 0x4cc   :  { %v491_v9 = vpop.f32.mrb[12].mxu1 }
 0x4cd   :  { %v1035_v10 = vpop.f32.mrb[13].mxu1 }
 0x4ce   :  { %v494_v11 = vpop.f32.mrb[14].mxu1  ;;  %v1482_v10 = vld [vmem:[%s1569_s7] ss:$0 sm:$0xff] }
 0x4cf   :  { %v501_v12 = vpack.c.bf16 %v494_v11, %v491_v9  ;;  %v1036_v13 = vpop.f32.mrb[15].mxu1 }
 0x4d1   :  { %1042 = vmatmul.mubr.msk.bf16.vlgmr.msra.gmra.mrb[4].mxu0 %vm133_vm0, %v501_v12 }
 0x4d2   :  { %1054 = vmatpush3.bf16.msra.mxu0 %v1084_v49 }
 0x4d3   :  { %1055 = vmatprep.subr.bf16.mxu0 %v1085_v50 }
 0x4d6   :  { %1056 = vmatpush3.bf16.msra.mxu0 %v1085_v50 }
 0x5a4   :  { %v1043_v15 = vpop.f32.mrb[4].mxu0 }
 0x5a5   :  { %v565_v16 = vpop.f32.mrb[5].mxu0  ;;  %v574_v18 = vadd.f32 %v1043_v15, %v952_v14 }
 0x5a6   :  { %v566_v19 = vadd.f32 %v952_v14, %v565_v16  ;;  %v1044_v20 = vpop.f32.mrb[6].mxu0 }
 0x5a7   :  { %v568_v17 = vpop.f32.mrb[7].mxu0  ;;  %v577_v23 = vadd.f32 %v1044_v20, %v952_v14  ;;  %v582_v26 = vadd.f32 %v574_v18, %v1411_v4 }
 0x5a8   :  { %v569_v21 = vadd.f32 %v952_v14, %v568_v17  ;;  %v580_v22 = vadd.f32 %v566_v19, %v1404_v2 }
 0x5a9   :  { %v590_v28 = vsel %vm133_vm0, %v582_v26, 0.0  ;;  %v583_v29 = vadd.f32 %v577_v23, %v1415_v6  ;;  %v1086_v23 = vld [vmem:[%s1572_s10 + $0x10] sm:$0xff]  }
 0x5aa   :  { %v584_v24 = vsel %vm133_vm0, %v580_v22, 0.0  ;;  %v581_v25 = vadd.f32 %v569_v21, %v1406_v3  ;;  %1057 = vmatprep.subr.bf16.mxu0 %v1086_v23 }
 0x5ab   :  { %585 = vadd.xlane.f32.xlu1 %v584_v24  ;;  %v593_v30 = vsel %vm133_vm0, %v583_v29, 0.0  ;;  %1058 = vmatpush3.bf16.msra.mxu0 %v1086_v23  ;;  %v1087_v24 = vld [vmem:[%s1572_s10 + $0x18] sm:$0xff]  }
 0x5ac   :  { %v587_v27 = vsel %vm133_vm0, %v581_v25, 0.0  ;;  %1059 = vmatprep.subr.bf16.mxu0 %v1087_v24 }
 0x5ad   :  { %588 = vadd.xlane.f32.xlu0 %v587_v27 }
 0x5af   :  { %591 = vadd.xlane.f32.xlu1 %v590_v28  ;;  %1060 = vmatpush3.bf16.msra.mxu0 %v1087_v24 }
 0x5b3   :  { %594 = vadd.xlane.f32.xlu1 %v593_v30 }
 0x638   :  { %v586_v2 = vpop.xlane.xlu1 %585 }
 0x639   :  { %v597_v31 = vmul.f32 0.03125, %v586_v2 }
 0x63a   :  { %v589_v32 = vpop.xlane.xlu0 %588 }
 0x63b   :  { %v601_v33 = vsub.f32 %v580_v22, %v597_v31  ;;  %v598_v34 = vmul.f32 0.03125, %v589_v32 }
 0x63c   :  { %v592_v3 = vpop.xlane.xlu1 %591 }
 0x63d   :  { %v602_v35 = vsub.f32 %v581_v25, %v598_v34  ;;  %v599_v4 = vmul.f32 0.03125, %v592_v3  ;;  %v605_v36 = vmul.f32 %v601_v33, %v601_v33  ;;  %v959_v25 = vld [vmem:[%s1571_s9] ss:$0 sm:$0xff]  ;;  %s1257_s9 = smov [#allocation10]  }
 0x63f   :  { %v603_v37 = vsub.f32 %v582_v26, %v599_v4  ;;  %v609_v38 = vsel %vm133_vm0, %v605_v36, 0.0  ;;  %v606_v39 = vmul.f32 %v602_v35, %v602_v35 }
 0x640   :  { %610 = vadd.xlane.f32.xlu1 %v609_v38  ;;  %v595_v40 = vpop.xlane.xlu1 %594 }
 0x641   :  { %v600_v6 = vmul.f32 0.03125, %v595_v40  ;;  %v612_v41 = vsel %vm133_vm0, %v606_v39, 0.0  ;;  %v607_v42 = vmul.f32 %v603_v37, %v603_v37 }
 0x642   :  { %613 = vadd.xlane.f32.xlu0 %v612_v41 }
 0x643   :  { %v604_v43 = vsub.f32 %v583_v29, %v600_v6  ;;  %v615_v44 = vsel %vm133_vm0, %v607_v42, 0.0 }
 0x644   :  { %616 = vadd.xlane.f32.xlu1 %v615_v44 }
 0x645   :  { %v608_v45 = vmul.f32 %v604_v43, %v604_v43 }
 0x647   :  { %v618_v46 = vsel %vm133_vm0, %v608_v45, 0.0 }
 0x648   :  { %619 = vadd.xlane.f32.xlu0 %v618_v46 }
 0x6cd   :  { %v611_v51 = vpop.xlane.xlu1 %610 }
 0x6ce   :  { %v621_v52 = vmul.f32 0.03125, %v611_v51 }
 0x6cf   :  { %v614_v53 = vpop.xlane.xlu0 %613 }
 0x6d0   :  { %v625_v54 = vadd.f32 1e-05, %v621_v52  ;;  %v622_v55 = vmul.f32 0.03125, %v614_v53 }
 0x6d1   :  { %v617_v56 = vpop.xlane.xlu1 %616 }
 0x6d2   :  { %1088 = vrsqrt.f32 %v625_v54  ;;  %v626_v57 = vadd.f32 1e-05, %v622_v55  ;;  %v623_v58 = vmul.f32 0.03125, %v617_v56 }
 0x6d4   :  { %1090 = vrsqrt.f32 %v626_v57  ;;  %v627_v59 = vadd.f32 1e-05, %v623_v58 }
 0x6d5   :  { %v620_v60 = vpop.xlane.xlu0 %619 }
 0x6d6   :  { %1092 = vrsqrt.f32 %v627_v59  ;;  %v624_v61 = vmul.f32 0.03125, %v620_v60 }
 0x6d8   :  { %v628_v62 = vadd.f32 1e-05, %v624_v61 }
 0x6da   :  { %1094 = vrsqrt.f32 %v628_v62 }
 0x6dc   :  { %v1089_v63 = vpop.eup %1088 }
 0x6dd   :  { %v633_v1 = vmul.f32 %v1089_v63, %v601_v33 }
 0x6de   :  { %v1091_v5 = vpop.eup %1090 }
 0x6df   :  { %v634_v7 = vmul.f32 %v1091_v5, %v602_v35  ;;  %v643_v8 = vmul.f32 %v1476_v0, %v633_v1 }
 0x6e0   :  { %v1093_v9 = vpop.eup %1092 }
 0x6e1   :  { %v635_v11 = vmul.f32 %v1093_v9, %v603_v37  ;;  %v644_v12 = vmul.f32 %v1476_v0, %v634_v7  ;;  %v653_v13 = vadd.f32 %v1482_v10, %v643_v8  ;;  %v964_v37 = vld [vmem:[%s1573_s11] ss:$0 sm:$0xff]  ;;  %s911_s11 = sshll.u32 %s1257_s9, 4  ;;  %s912_s11 = int_to_ptr.vmem [resolvable:$true] %s911_s11 }
 0x6e2   :  { %s1192_s26 = scalar_lea.vmem %s912_s11, 256  ;;  %p1197_p5 = scmp.lt.s32.totalorder %s912_s11, %s912_s11 }
 0x6e3   :  { %v654_v14 = vadd.f32 %v1482_v10, %v644_v12  ;;  %v645_v16 = vmul.f32 %v1476_v0, %v635_v11  ;;  %p1193_p4 = scmp.ne.s32.totalorder %s912_s11, %s1192_s26  ;;  %p1198_p6 = scmp.lt.s32.totalorder %s1192_s26, %s1192_s26 }
 0x6e4   :  { %v1095_v15 = vpop.eup %1094 }
 0x6e5   :  { %v636_v18 = vmul.f32 %v1095_v15, %v604_v43  ;;  %v657_v19 = vpack.c.bf16 %v654_v14, %v653_v13  ;;  %v655_v17 = vadd.f32 %v1482_v10, %v645_v16  ;;  %p1199_p7 = por %p1198_p6, %p1197_p5 }
 0x6e7   :  { %v646_v20 = vmul.f32 %v1476_v0, %v636_v18  ;;  %1049 = vmatprep.mubr.msk.bf16.mxu1 %vm133_vm0, %v657_v19  ;;  %p1200_p8 = pnand %p1199_p7, %p1193_p4 }
 0x6e9   :  { %v656_v21 = vadd.f32 %v1482_v10, %v646_v20 }
 0x6eb   :  { %v658_v22 = vpack.c.bf16 %v656_v21, %v655_v17 }
 0x6ed   :  { %1050 = vmatmul.mubr.msk.bf16.vlgmr.msra.gmra.mrb[16].mxu1 %vm133_vm0, %v658_v22 }
 0x7c0   :  { %v1051_v26 = vpop.f32.mrb[16].mxu1 }
 0x7c1   :  { %v731_v27 = vadd.f32 %v1051_v26, %v959_v25  ;;  %v722_v28 = vpop.f32.mrb[17].mxu1 }
 0x7c2   :  { %v723_v29 = vadd.f32 %v959_v25, %v722_v28  ;;  %v1052_v30 = vpop.f32.mrb[18].mxu1 }
 0x7c3   :  { %v734_v2 = vadd.f32 %v1052_v30, %v959_v25  ;;  %v725_v31 = vpop.f32.mrb[19].mxu1  ;;  %v739_v33 = vmax.f32 %v731_v27, 0.0 }
 0x7c4   :  { %v726_v32 = vadd.f32 %v959_v25, %v725_v31  ;;  %v737_v3 = vmax.f32 %v723_v29, 0.0 }
 0x7c5   :  { %v740_v34 = vmax.f32 %v734_v2, 0.0 }
 0x7c6   :  { %v738_v35 = vmax.f32 %v726_v32, 0.0 }
 0x7c7   :  { %v742_v4 = vpack.c.bf16 %v740_v34, %v739_v33 }
 0x7c8   :  { %v741_v36 = vpack.c.bf16 %v738_v35, %v737_v3 }
 0x7ca   :  { %1061 = vmatprep.mubr.msk.bf16.mxu0 %vm782_vm3, %v741_v36 }
 0x7cb   :  { %1062 = vmatmul.mubr.msk.bf16.vlgmr.msra.gmra.mrb[8].mxu0 %vm782_vm3, %v742_v4 }
 0x89e   :  { %v1063_v38 = vpop.f32.mrb[8].mxu0 }
 0x89f   :  { %v823_v39 = vpop.f32.mrb[9].mxu0  ;;  %v832_v40 = vadd.f32 %v1063_v38, %v964_v37 }
 0x8a0   :  { %v824_v6 = vadd.f32 %v964_v37, %v823_v39  ;;  %v1064_v41 = vpop.f32.mrb[10].mxu0 }
 0x8a1   :  { %v826_v42 = vpop.f32.mrb[11].mxu0  ;;  %v835_v43 = vadd.f32 %v1064_v41, %v964_v37  ;;  %v840_v48 = vadd.f32 %v832_v40, %v655_v17 }
 0x8a2   :  { %v827_v44 = vadd.f32 %v964_v37, %v826_v42  ;;  %v838_v45 = vadd.f32 %v824_v6, %v653_v13 }
 0x8a3   :  { %v841_v50 = vadd.f32 %v835_v43, %v656_v21  ;;  %v848_v51 = vsel %vm133_vm0, %v840_v48, 0.0 }
 0x8a4   :  { %v842_v46 = vsel %vm133_vm0, %v838_v45, 0.0  ;;  %v839_v47 = vadd.f32 %v827_v44, %v654_v14 }
 0x8a5   :  { %843 = vadd.xlane.f32.xlu1 %v842_v46  ;;  %v851_v52 = vsel %vm133_vm0, %v841_v50, 0.0 }
 0x8a6   :  { %v845_v49 = vsel %vm133_vm0, %v839_v47, 0.0 }
 0x8a7   :  { %846 = vadd.xlane.f32.xlu0 %v845_v49 }
 0x8a9   :  { %849 = vadd.xlane.f32.xlu1 %v848_v51 }
 0x8ab   :  { %852 = vadd.xlane.f32.xlu0 %v851_v52 }
 0x932   :  { %v844_v53 = vpop.xlane.xlu1 %843 }
 0x933   :  { %v854_v54 = vmul.f32 0.03125, %v844_v53 }
 0x934   :  { %v847_v55 = vpop.xlane.xlu0 %846 }
 0x935   :  { %v858_v56 = vsub.f32 %v838_v45, %v854_v54  ;;  %v855_v57 = vmul.f32 0.03125, %v847_v55 }
 0x936   :  { %v850_v58 = vpop.xlane.xlu1 %849 }
 0x937   :  { %v859_v59 = vsub.f32 %v839_v47, %v855_v57  ;;  %v856_v60 = vmul.f32 0.03125, %v850_v58  ;;  %v862_v61 = vmul.f32 %v858_v56, %v858_v56 }
 0x938   :  { %v853_v62 = vpop.xlane.xlu0 %852 }
 0x939   :  { %v860_v63 = vsub.f32 %v840_v48, %v856_v60  ;;  %v857_v1 = vmul.f32 0.03125, %v853_v62  ;;  %v866_v5 = vsel %vm133_vm0, %v862_v61, 0.0  ;;  %v863_v7 = vmul.f32 %v859_v59, %v859_v59 }
 0x93a   :  { %867 = vadd.xlane.f32.xlu1 %v866_v5 }
 0x93b   :  { %v861_v8 = vsub.f32 %v841_v50, %v857_v1  ;;  %v869_v9 = vsel %vm133_vm0, %v863_v7, 0.0  ;;  %v864_v11 = vmul.f32 %v860_v63, %v860_v63 }
 0x93c   :  { %870 = vadd.xlane.f32.xlu0 %v869_v9 }
 0x93d   :  { %v872_v12 = vsel %vm133_vm0, %v864_v11, 0.0  ;;  %v865_v13 = vmul.f32 %v861_v8, %v861_v8 }
 0x93e   :  { %873 = vadd.xlane.f32.xlu1 %v872_v12 }
 0x93f   :  { %v875_v14 = vsel %vm133_vm0, %v865_v13, 0.0 }
 0x940   :  { %876 = vadd.xlane.f32.xlu0 %v875_v14 }
 0x9c7   :  { %v868_v15 = vpop.xlane.xlu1 %867 }
 0x9c8   :  { %v878_v16 = vmul.f32 0.03125, %v868_v15 }
 0x9c9   :  { %v871_v18 = vpop.xlane.xlu0 %870 }
 0x9ca   :  { %v882_v19 = vadd.f32 1e-05, %v878_v16  ;;  %v879_v20 = vmul.f32 0.03125, %v871_v18 }
 0x9cb   :  { %v874_v17 = vpop.xlane.xlu1 %873 }
 0x9cc   :  { %1096 = vrsqrt.f32 %v882_v19  ;;  %v883_v21 = vadd.f32 1e-05, %v879_v20  ;;  %v880_v22 = vmul.f32 0.03125, %v874_v17 }
 0x9cd   :  { %v877_v23 = vpop.xlane.xlu0 %876 }
 0x9ce   :  { %1098 = vrsqrt.f32 %v883_v21  ;;  %v884_v24 = vadd.f32 1e-05, %v880_v22  ;;  %v881_v25 = vmul.f32 0.03125, %v877_v23 }
 0x9d0   :  { %1100 = vrsqrt.f32 %v884_v24  ;;  %v885_v26 = vadd.f32 1e-05, %v881_v25 }
 0x9d2   :  { %1102 = vrsqrt.f32 %v885_v26 }
 0x9d6   :  { %v1097_v27 = vpop.eup %1096 }
 0x9d7   :  { %v890_v28 = vmul.f32 %v1097_v27, %v858_v56 }
 0x9d8   :  { %v1099_v29 = vpop.eup %1098 }
 0x9d9   :  { %v894_v30 = vmul.f32 %v1476_v0, %v890_v28  ;;  %v891_v2 = vmul.f32 %v1099_v29, %v859_v59 }
 0x9da   :  { %v1101_v31 = vpop.eup %1100 }
 0x9db   :  { %v892_v32 = vmul.f32 %v1101_v31, %v860_v63  ;;  %v898_v33 = vadd.f32 %v1482_v10, %v894_v30  ;;  %v895_v34 = vmul.f32 %v1476_v0, %v891_v2 }
 0x9dc   :  { %v1103_v3 = vpop.eup %1102 }
 0x9dd   :  { %v893_v35 = vmul.f32 %v1103_v3, %v861_v8  ;;  %v896_v4 = vmul.f32 %v1476_v0, %v892_v32  ;;  %902 = vst.msk [vmem:[#allocation10] sm:$0xff] %vm133_vm0, %v898_v33  ;;  %v899_v36 = vadd.f32 %v1482_v10, %v895_v34 }
 0x9df   :  { %v900_v37 = vadd.f32 %v1482_v10, %v896_v4  ;;  %v897_v38 = vmul.f32 %v1476_v0, %v893_v35  ;;  %903 = vst.msk [vmem:[#allocation11] sm:$0xff] %vm133_vm0, %v899_v36 }
 0x9e1   :  { %904 = vst.msk [vmem:[#allocation10 + $0x8] sm:$0xff] %vm133_vm0, %v900_v37  ;;  %v901_v39 = vadd.f32 %v1482_v10, %v897_v38 }
 0x9e2   :  { %1203 = shalt.err (!%p1200_p8)
}
 0x9e3   :  { %s1204_s16 = scalar_lea.hbm %s1575_s13, 256 }
 0x9e4   :  { %p1205_p9 = scmp.ne.s32.totalorder %s1575_s13, %s1204_s16  ;;  %p1208_p10 = scmp.lt.u32.totalorder %s1204_s16, %s1575_s13 }
 0x9e6   :  { %p1210_p11 = pnand %p1208_p10, %p1205_p9 }
 0x9e8   :  { %1213 = shalt.err (!%p1210_p11)
}
 0x9e9   :  { %917 = dma.vmem_to_hbm [thread:$0]  %s912_s11, 256, %s1575_s13, [#allocation4], %s1250_s2, %s1250_s2, %s1251_s30   ;;  %905 = vst.msk [vmem:[#allocation11 + $0x8] sm:$0xff] %vm133_vm0, %v901_v39 }
 0x9ea   :  { %s1214_s4 = scalar_lea.vmem %s1524_s28, 256  ;;  %p1219_p13 = scmp.lt.s32.totalorder %s1524_s28, %s1524_s28 }
 0x9eb   :  { %p1215_p12 = scmp.ne.s32.totalorder %s1524_s28, %s1214_s4  ;;  %p1220_p0 = scmp.lt.s32.totalorder %s1214_s4, %s1214_s4 }
 0x9ed   :  { %p1221_p1 = por %p1220_p0, %p1219_p13 }
 0x9ef   :  { %p1222_p2 = pnand %p1221_p1, %p1215_p12 }
 0x9f1   :  { %1225 = shalt.err (!%p1222_p2)
}
 0x9f2   :  { %s1226_s1 = scalar_lea.hbm %s1576_s14, 256 }
 0x9f3   :  { %p1227_p3 = scmp.ne.s32.totalorder %s1576_s14, %s1226_s1  ;;  %p1230_p4 = scmp.lt.u32.totalorder %s1226_s1, %s1576_s14 }
 0x9f5   :  { %p1232_p5 = pnand %p1230_p4, %p1227_p3 }
 0x9f7   :  { %1235 = shalt.err (!%p1232_p5)
}
 0x9f8   :  { %929 = dma.vmem_to_hbm [thread:$0]  %s1524_s28, 256, %s1576_s14, [#allocation12], %s1250_s2, %s1250_s2, %s1251_s30  }
 0x9f9   :  { %1242 = dma.done.wait [#allocation4], 256  }
 0x9fa   :  { %1243 = vsyncadd [#allocation4], 4294967040 }
 0x9fb   :  { %1244 = dma.done.wait [#allocation12], 256  }
 0x9fc   :  { %1245 = vsyncadd [#allocation12], 4294967040 }
 0x9fd   :  { %936 = vsyncpa [#allocation3], 1 }
 0x9fe   :  { %937 = vsyncpa [#allocation6], 1 }
 0x9ff   :  { %938 = vsyncpa [#allocation9], 1 }
 0xa00   :  { %939 = vsyncpa [#allocation4], 1 }
 0xa01   :  { %940 = vsyncpa [#allocation12], 1 }

</bundles_post_ra>
